<compile_context>
chip_gen: v7x
topology: tpu7x:2x2x1
jax: 0.10.0
libtpu: 0.0.40
codegen_flags: <defaults>
</compile_context>

<pallas_src>
import jax
import jax.numpy as jnp
from jax.experimental import pallas as pl
from jax.experimental.pallas import tpu as pltpu


def dot_attention_kernel(x_ref, v_ref, rep_ref, w_ref):
    x = x_ref[...]                                   # (TB, L, H), input dtype
    v = v_ref[...]                                   # (1, H),     input dtype

    # scores = bmm(inputs, attn_vector^T): multiply in the input dtype,
    # f32-accumulating lane reduce.  Kept as (TB, L, 1) so the attention
    # weights are already laid out for the sublane-L broadcast below.
    scores = jnp.sum(
        x * v.reshape(1, 1, -1), axis=-1, keepdims=True, dtype=jnp.float32
    )                                                # (TB, L, 1) f32

    # softmax(relu(scores)) over the sequence axis (f32 stats).
    s = jnp.maximum(scores, 0.0)
    m = jnp.max(s, axis=1, keepdims=True)            # (TB, 1, 1)
    e = jnp.exp(s - m)
    denom = jnp.sum(e, axis=1, keepdims=True)        # (TB, 1, 1)
    # PyTorch's post-softmax renormalization is an identity and is dropped.
    # Exact reciprocal (see header note on approx=True vs the 1e-5 tolerance).
    p = e * pl.reciprocal(denom)                     # (TB, L, 1) f32
    w_ref[...] = p.astype(w_ref.dtype)

    # representations[b] = sum_l p[b, l] * x[b, l, :]: VPU multiply in the
    # input dtype, f32-accumulating reduce over the sublane (L) axis.
    pw = p.astype(x.dtype)                           # (TB, L, 1)
    rep3 = jnp.sum(x * pw, axis=1, keepdims=True, dtype=jnp.float32)  # (TB,1,H)
    rep_ref[...] = rep3[:, 0, :].astype(rep_ref.dtype)


def _plan(B: int, L: int, H: int, itemsize: int):
    """Pick the batch tile TB and the scoped VMEM limit."""
    try:
        vmem_physical = int(pltpu.get_tpu_info().vmem_capacity_bytes)
    except Exception:
        vmem_physical = 128 * 1024 * 1024            # v5e/v6e physical VMEM

    if vmem_physical <= 64 * 1024 * 1024:
        # v7x: 64 MiB physical per TensorCore -> ~46 MiB scoped, leaving
        # headroom for Mosaic internal scratch and the outputs' buffers.
        vmem_limit = 46 * 1024 * 1024
    else:
        # v5e / v6e: 128 MiB physical.
        vmem_limit = 64 * 1024 * 1024
    vmem_limit = min(vmem_limit, vmem_physical)

    # Per-batch-row VMEM footprint of one grid step:
    #   2 double-buffered pipeline copies of the x block
    # + ~1 block-sized elementwise-product temporary (budgeted at f32 width)
    # + double-buffered output rows + small f32 score/softmax vectors.
    x_row = L * H * itemsize
    tmp_row = L * H * 4
    out_row = 2 * (L + H) * itemsize
    vec_row = 8 * (L + H) * 4
    per_row = 2 * x_row + tmp_row + out_row + vec_row

    max_rows = vmem_limit // per_row
    if max_rows >= B:
        tb = B                          # whole batch fits in a single block
    elif max_rows >= 8:
        tb = (max_rows // 8) * 8        # 8-row multiple; Pallas masks the tail
    else:
        # TODO(synk): fall back to an L-axis (flash-style running softmax)
        # grid when even an 8-row block exceeds the VMEM budget.
        raise NotImplementedError(
            f"DotAttention block of 8 rows x (L={L}, H={H}) exceeds the "
            f"scoped VMEM budget ({vmem_limit} bytes); an L-axis grid with a "
            "running softmax is required for this shape.")
    return tb, vmem_limit


def dot_attention(inputs, attn_vector):
    """Pallas TPU DotAttention forward: returns (representations, attn_weights)."""
    B, L, H = inputs.shape
    dtype = inputs.dtype
    TB, vmem_limit = _plan(B, L, H, jnp.dtype(dtype).itemsize)

    v = attn_vector.astype(dtype)                    # (1, H), VMEM-resident

    rep, w3 = pl.pallas_call(
        dot_attention_kernel,
        grid=(pl.cdiv(B, TB),),
        in_specs=[
            pl.BlockSpec((TB, L, H), lambda i: (i, 0, 0)),
            pl.BlockSpec((1, H), lambda i: (0, 0)),      # resident across steps
        ],
        out_specs=(
            pl.BlockSpec((TB, H), lambda i: (i, 0)),
            pl.BlockSpec((TB, L, 1), lambda i: (i, 0, 0)),
        ),
        out_shape=(
            jax.ShapeDtypeStruct((B, H), dtype),         # representations
            jax.ShapeDtypeStruct((B, L, 1), dtype),      # attention weights
        ),
        compiler_params=pltpu.CompilerParams(
            dimension_semantics=("parallel",),
            vmem_limit_bytes=int(vmem_limit),
        ),
    )(inputs, v)

    return rep, w3[:, :, 0]


def dot_attention_ref(inputs, attn_vector):
    scores = jnp.einsum("blh,oh->bl", inputs, attn_vector)
    p = jax.nn.softmax(jnp.maximum(scores, 0.0), axis=1)
    # PyTorch renormalizes by sum(dim=1); softmax already sums to 1 -> identity.
    rep = jnp.einsum("bl,blh->bh", p, inputs)
    return rep, p


if __name__ == "__main__":
    B, L, H = 2, 8, 32
    key = jax.random.PRNGKey(0)
    k_x, k_v = jax.random.split(key)

    inputs = jax.random.normal(k_x, (B, L, H), dtype=jnp.float32)

    # Deterministic xavier_uniform-style init for attn_vector of shape (1, H):
    # fan_in = H, fan_out = 1 -> bound = sqrt(6 / (H + 1))
    bound = (6.0 / (H + 1)) ** 0.5
    attn_vector = jax.random.uniform(
        k_v, (1, H), dtype=jnp.float32, minval=-bound, maxval=bound
    )

    rep, attn_w = dot_attention(inputs, attn_vector)
    jax.block_until_ready((rep, attn_w))

    rep_ref, attn_w_ref = dot_attention_ref(inputs, attn_vector)
    assert rep.shape == (B, H) and attn_w.shape == (B, L)
    assert jnp.allclose(rep, rep_ref, atol=1e-5, rtol=1e-5)
    assert jnp.allclose(attn_w, attn_w_ref, atol=1e-5, rtol=1e-5)

    print("KERNEL_OK")
</pallas_src>

<mosaic_0001>
module attributes {stable_mosaic.version = 11 : i64} {
  func.func @dot_attention_kernel(%arg0: i32, %arg1: memref<2x8x32xf32, #tpu.memory_space<vmem>>, %arg2: memref<1x32xf32, #tpu.memory_space<vmem>>, %arg3: memref<2x32xf32, #tpu.memory_space<vmem>>, %arg4: memref<2x8x1xf32, #tpu.memory_space<vmem>>) attributes {dimension_semantics = [#tpu.dimension_semantics<parallel>], iteration_bounds = array<i64: 1>, scalar_prefetch = 0 : i64, scratch_operands = 0 : i64, tpu.core_type = #tpu.core_type<tc>, window_params = [{transform_indices = @transform_0, window_bounds = array<i64: 2, 8, 32>}, {pipeline_mode = #tpu.pipeline_mode<synchronous>, transform_indices = @transform_1, window_bounds = array<i64: 1, 32>}, {transform_indices = @transform_2, window_bounds = array<i64: 2, 32>}, {transform_indices = @transform_3, window_bounds = array<i64: 2, 8, 1>}]} {
    %c0 = arith.constant 0 : index
    %c0_0 = arith.constant 0 : index
    %c0_1 = arith.constant 0 : index
    %0 = vector.load %arg1[%c0, %c0_0, %c0_1] : memref<2x8x32xf32, #tpu.memory_space<vmem>>, vector<2x8x32xf32>
    %c0_2 = arith.constant 0 : index
    %c0_3 = arith.constant 0 : index
    %1 = vector.load %arg2[%c0_2, %c0_3] : memref<1x32xf32, #tpu.memory_space<vmem>>, vector<1x32xf32>
    %2 = vector.shape_cast %1 : vector<1x32xf32> to vector<1x1x32xf32>
    %3 = vector.broadcast %2 : vector<1x1x32xf32> to vector<2x8x32xf32>
    %4 = arith.mulf %0, %3 : vector<2x8x32xf32>
    %cst = arith.constant dense<0.000000e+00> : vector<2x8xf32>
    %5 = vector.multi_reduction <add>, %4, %cst [2] : vector<2x8x32xf32> to vector<2x8xf32>
    %6 = vector.shape_cast %5 : vector<2x8xf32> to vector<2x8x1xf32>
    %cst_4 = arith.constant 0.000000e+00 : f32
    %7 = vector.broadcast %cst_4 : f32 to vector<2x8x1xf32>
    %8 = arith.maximumf %6, %7 : vector<2x8x1xf32>
    %cst_5 = arith.constant dense<0xFF800000> : vector<2x1xf32>
    %9 = vector.multi_reduction <maximumf>, %8, %cst_5 [1] : vector<2x8x1xf32> to vector<2x1xf32>
    %10 = vector.shape_cast %9 : vector<2x1xf32> to vector<2x1x1xf32>
    %11 = vector.broadcast %10 : vector<2x1x1xf32> to vector<2x8x1xf32>
    %12 = arith.subf %8, %11 : vector<2x8x1xf32>
    %13 = math.exp %12 : vector<2x8x1xf32>
    %cst_6 = arith.constant dense<0.000000e+00> : vector<2x1xf32>
    %14 = vector.multi_reduction <add>, %13, %cst_6 [1] : vector<2x8x1xf32> to vector<2x1xf32>
    %15 = vector.shape_cast %14 : vector<2x1xf32> to vector<2x1x1xf32>
    %16 = tpu.reciprocal %15 : vector<2x1x1xf32> -> vector<2x1x1xf32>
    %17 = vector.broadcast %16 : vector<2x1x1xf32> to vector<2x8x1xf32>
    %18 = arith.mulf %13, %17 : vector<2x8x1xf32>
    %c0_7 = arith.constant 0 : index
    %c0_8 = arith.constant 0 : index
    %c0_9 = arith.constant 0 : index
    %19 = vector.load %arg4[%c0_7, %c0_8, %c0_9] : memref<2x8x1xf32, #tpu.memory_space<vmem>>, vector<2x8x1xf32>
    tpu.vector_store %arg4[%c0_7, %c0_8, %c0_9], %18 {strides = array<i32>} : memref<2x8x1xf32, #tpu.memory_space<vmem>>, vector<2x8x1xf32>,
    %20 = vector.broadcast %18 : vector<2x8x1xf32> to vector<2x8x32xf32>
    %21 = arith.mulf %0, %20 : vector<2x8x32xf32>
    %cst_10 = arith.constant dense<0.000000e+00> : vector<2x32xf32>
    %22 = vector.multi_reduction <add>, %21, %cst_10 [1] : vector<2x8x32xf32> to vector<2x32xf32>
    %23 = vector.shape_cast %22 : vector<2x32xf32> to vector<2x1x32xf32>
    %24 = vector.shape_cast %23 : vector<2x1x32xf32> to vector<2x32xf32>
    %c0_11 = arith.constant 0 : index
    %c0_12 = arith.constant 0 : index
    %25 = vector.load %arg3[%c0_11, %c0_12] : memref<2x32xf32, #tpu.memory_space<vmem>>, vector<2x32xf32>
    tpu.vector_store %arg3[%c0_11, %c0_12], %24 {strides = array<i32>} : memref<2x32xf32, #tpu.memory_space<vmem>>, vector<2x32xf32>,
    return
  }
  func.func @transform_0(%arg0: i32) -> (i32, i32, i32) {
    %c0_i32 = arith.constant 0 : i32
    %c0_i32_0 = arith.constant 0 : i32
    %c0_i32_1 = arith.constant 0 : i32
    return %arg0, %c0_i32, %c0_i32_0 : i32, i32, i32
  }
  func.func @transform_1(%arg0: i32) -> (i32, i32) {
    %c0_i32 = arith.constant 0 : i32
    %c0_i32_0 = arith.constant 0 : i32
    %c0_i32_1 = arith.constant 0 : i32
    return %c0_i32, %c0_i32_0 : i32, i32
  }
  func.func @transform_2(%arg0: i32) -> (i32, i32) {
    %c0_i32 = arith.constant 0 : i32
    %c0_i32_0 = arith.constant 0 : i32
    return %arg0, %c0_i32 : i32, i32
  }
  func.func @transform_3(%arg0: i32) -> (i32, i32, i32) {
    %c0_i32 = arith.constant 0 : i32
    %c0_i32_0 = arith.constant 0 : i32
    %c0_i32_1 = arith.constant 0 : i32
    return %arg0, %c0_i32, %c0_i32_0 : i32, i32, i32
  }
}

</mosaic_0001>

<bundles_post_ra>
// kernel: tpu_custom_call.1
= control target key start
LH: loop header
LB: loop body
LE: loop exit
PB: predicated region body
PF: predicated region fallthrough
CT: control target
= control target key end

     0   :  { %9 = vsyncpa [#allocation3], 0  ;;  %s348_s0 = inlined_call_operand.hbm [shape: f32[2,8,32], index: 0, kind: input, shape index: {}]   ;;  %s349_s1 = inlined_call_operand.hbm [shape: f32[1,32], index: 1, kind: input, shape index: {}]   ;;  %s350_s2 = inlined_call_operand.hbm [shape: f32[2,32], index: 2, kind: output, shape index: {0}]   ;;  %s351_s3 = inlined_call_operand.hbm [shape: f32[2,8,1], index: 3, kind: output, shape index: {1}]  }
   0x1   :  { %10 = vsyncpa [#allocation6], 0 }
   0x2   :  { %11 = vsyncpa [#allocation4], 0 }
   0x3   :  { %12 = vsyncpa [#allocation9], 0  ;;  %s264_s12 = smov [#allocation2]   ;;  %s168_s16 = scalar_lea.hbm %s348_s0, 256 }
   0x4   :  { %s18_s13 = sshll.u32 %s264_s12, 4  ;;  %p169_p0 = scmp.ne.s32.totalorder %s348_s0, %s168_s16  ;;  %s19_s13 = int_to_ptr.vmem [resolvable:$true] %s18_s13 }
   0x5   :  { %p172_p1 = scmp.lt.u32.totalorder %s168_s16, %s348_s0 }
   0x7   :  { %p174_p2 = pnand %p172_p1, %p169_p0 }
   0x9   :  { %177 = shalt.err (!%p174_p2)
}
   0xa   :  { %s178_s21 = scalar_lea.vmem %s19_s13, 256  ;;  %p183_p4 = scmp.lt.s32.totalorder %s19_s13, %s19_s13 }
   0xb   :  { %p179_p3 = scmp.ne.s32.totalorder %s19_s13, %s178_s21  ;;  %p184_p5 = scmp.lt.s32.totalorder %s178_s21, %s178_s21 }
   0xd   :  { %p185_p6 = por %p184_p5, %p183_p4 }
   0xf   :  { %p186_p7 = pnand %p185_p6, %p179_p3 }
  0x11   :  { %189 = shalt.err (!%p186_p7)
}
  0x12   :  { %s265_s22 = smov 128   ;;  %s266_s23 = smov 8  }
  0x13   :  { %24 = dma.hbm_to_vmem [thread:$0]  %s348_s0, 256, %s19_s13, [#allocation3], %s265_s22, %s265_s22, %s266_s23  }
  0x14   :  { %s267_s26 = smov [#allocation5]   ;;  %s190_s30 = scalar_lea.hbm %s349_s1, 16 }
  0x15   :  { %s31_s27 = sshll.u32 %s267_s26, 4  ;;  %p191_p8 = scmp.ne.s32.totalorder %s349_s1, %s190_s30  ;;  %s32_s27 = int_to_ptr.vmem [resolvable:$true] %s31_s27 }
  0x16   :  { %p194_p9 = scmp.lt.u32.totalorder %s190_s30, %s349_s1 }
  0x18   :  { %p196_p10 = pnand %p194_p9, %p191_p8 }
  0x1a   :  { %199 = shalt.err (!%p196_p10)
}
  0x1b   :  { %s200_s8 = scalar_lea.vmem %s32_s27, 16  ;;  %s204_s0 = scalar_lea.vmem %s32_s27, 32 }
  0x1c   :  { %p201_p11 = scmp.ne.s32.totalorder %s32_s27, %s200_s8  ;;  %p205_p12 = scmp.lt.s32.totalorder %s32_s27, %s32_s27 }
  0x1d   :  { %p206_p13 = scmp.lt.s32.totalorder %s204_s0, %s200_s8 }
  0x1f   :  { %p207_p0 = por %p206_p13, %p205_p12 }
  0x21   :  { %p208_p1 = pnand %p207_p0, %p201_p11 }
  0x23   :  { %211 = shalt.err (!%p208_p1)
}
  0x24   :  { %34 = dma.hbm_to_vmem [thread:$0]  %s349_s1, 16, %s32_s27, [#allocation6]  }
  0x25   :  { %256 = dma.done.wait [#allocation3], 256  }
  0x26   :  { %257 = vsyncadd [#allocation3], 4294967040 }
  0x27   :  { %258 = dma.done.wait [#allocation6], 16  }
  0x28   :  { %259 = vsyncadd [#allocation6], 4294967280  ;;  %v41_v0 = vld [vmem:[#allocation2] sm:$0xff]  ;;  %v153_v1 = vld [vmem:[#allocation5] ss:$0 sm:$0xff]  ;;  %vm52_vm0 = vcmask 261120  }
  0x29   :  { %v42_v2 = vld [vmem:[#allocation2 + $0x8] sm:$0xff]  ;;  %v50_v3 = vmul.f32 %v153_v1, %v41_v0  ;;  %vm95_vm1 = vcmask 7168   ;;  %s268_s1 = smov [#allocation8]  }
  0x2a   :  { %v51_v4 = vmul.f32 %v153_v1, %v42_v2  ;;  %s136_s11 = sshll.u32 %s268_s1, 4  ;;  %s137_s11 = int_to_ptr.vmem [resolvable:$true] %s136_s11 }
  0x2b   :  { %v53_v5 = vsel %vm52_vm0, %v50_v3, 0.0  ;;  %s212_s12 = scalar_lea.vmem %s137_s11, 256  ;;  %p217_p3 = scmp.lt.s32.totalorder %s137_s11, %s137_s11 }
  0x2c   :  { %54 = vadd.xlane.f32.xlu0 %v53_v5  ;;  %v56_v6 = vsel %vm52_vm0, %v51_v4, 0.0  ;;  %p213_p2 = scmp.ne.s32.totalorder %s137_s11, %s212_s12  ;;  %p218_p4 = scmp.lt.s32.totalorder %s212_s12, %s212_s12 }
  0x2e   :  { %p219_p5 = por %p218_p4, %p217_p3 }
  0x30   :  { %57 = vadd.xlane.f32.xlu0 %v56_v6  ;;  %p220_p6 = pnand %p219_p5, %p213_p2 }
  0xb9   :  { %v55_v7 = vpop.xlane.xlu0 %54 }
  0xba   :  { %v59_v8 = vmax.f32 %v55_v7, 0.0 }
  0xbc   :  { %v61_v9 = vrot.slane %v59_v8, 4 }
  0xbd   :  { %v58_v10 = vpop.xlane.xlu0 %57 }
  0xbe   :  { %v62_v11 = vmax.f32 %v59_v8, %v61_v9  ;;  %v60_v12 = vmax.f32 %v58_v10, 0.0 }
  0xc0   :  { %v63_v13 = vrot.slane %v62_v11, 2  ;;  %v67_v14 = vrot.slane %v60_v12, 4 }
  0xc2   :  { %v64_v15 = vmax.f32 %v62_v11, %v63_v13  ;;  %v68_v16 = vmax.f32 %v60_v12, %v67_v14 }
  0xc4   :  { %v65_v17 = vrot.slane %v64_v15, 1  ;;  %v69_v18 = vrot.slane %v68_v16, 2 }
  0xc6   :  { %v66_v19 = vmax.f32 %v64_v15, %v65_v17  ;;  %v70_v20 = vmax.f32 %v68_v16, %v69_v18 }
  0xc8   :  { %v73_v21 = vsub.f32 %v59_v8, %v66_v19  ;;  %v71_v22 = vrot.slane %v70_v20, 1 }
  0xca   :  { %v75_v23 = vmul.f32 1.442695, %v73_v21  ;;  %v72_v24 = vmax.f32 %v70_v20, %v71_v22 }
  0xcc   :  { %160 = vpow2.f32 %v75_v23  ;;  %v74_v25 = vsub.f32 %v60_v12, %v72_v24 }
  0xce   :  { %v77_v26 = vmul.f32 1.442695, %v74_v25 }
  0xd0   :  { %162 = vpow2.f32 %v77_v26 }
  0xd6   :  { %v161_v27 = vpop.eup %160 }
  0xd7   :  { %v79_v28 = vrot.slane %v161_v27, 4 }
  0xd9   :  { %v80_v29 = vadd.f32 %v161_v27, %v79_v28 }
  0xda   :  { %v163_v30 = vpop.eup %162 }
  0xdb   :  { %v81_v31 = vrot.slane %v80_v29, 2  ;;  %v85_v32 = vrot.slane %v163_v30, 4 }
  0xdd   :  { %v86_v33 = vadd.f32 %v163_v30, %v85_v32  ;;  %v82_v34 = vadd.f32 %v81_v31, %v80_v29 }
  0xdf   :  { %v87_v35 = vrot.slane %v86_v33, 2  ;;  %v83_v36 = vrot.slane %v82_v34, 1 }
  0xe1   :  { %v84_v37 = vadd.f32 %v83_v36, %v82_v34  ;;  %v88_v38 = vadd.f32 %v87_v35, %v86_v33 }
  0xe3   :  { %v89_v39 = vrot.slane %v88_v38, 1  ;;  %164 = vrcp.f32 %v84_v37 }
  0xe5   :  { %v90_v40 = vadd.f32 %v89_v39, %v88_v38 }
  0xe7   :  { %166 = vrcp.f32 %v90_v40 }
  0xed   :  { %v165_v41 = vpop.eup %164 }
  0xee   :  { %v93_v42 = vmul.f32 %v165_v41, %v161_v27 }
  0xf0   :  { %v98_v43 = vmul.f32 %v93_v42, %v41_v0  ;;  %96 = vst.msk [vmem:[#allocation8] sm:$0xff] %vm95_vm1, %v93_v42 }
  0xf1   :  { %v167_v44 = vpop.eup %166 }
  0xf2   :  { %v94_v45 = vmul.f32 %v167_v44, %v163_v30  ;;  %v100_v46 = vsel %vm52_vm0, %v98_v43, 0.0 }
  0xf3   :  { %v101_v47 = vrot.slane %v100_v46, 4 }
  0xf4   :  { %v99_v48 = vmul.f32 %v94_v45, %v42_v2  ;;  %97 = vst.msk [vmem:[#allocation8 + $0x8] sm:$0xff] %vm95_vm1, %v94_v45 }
  0xf5   :  { %v102_v49 = vadd.f32 %v101_v47, %v100_v46 }
  0xf6   :  { %223 = shalt.err (!%p220_p6)
}
  0xf7   :  { %s224_s15 = scalar_lea.hbm %s351_s3, 256 }
  0xf8   :  { %p225_p7 = scmp.ne.s32.totalorder %s351_s3, %s224_s15  ;;  %p228_p8 = scmp.lt.u32.totalorder %s224_s15, %s351_s3 }
  0xfa   :  { %p230_p9 = pnand %p228_p8, %p225_p7 }
  0xfc   :  { %233 = shalt.err (!%p230_p9)
}
  0xfd   :  { %142 = dma.vmem_to_hbm [thread:$0]  %s137_s11, 256, %s351_s3, [#allocation9], %s265_s22, %s265_s22, %s266_s23   ;;  %v107_v50 = vsel %vm52_vm0, %v99_v48, 0.0  ;;  %v103_v51 = vrot.slane %v102_v49, 2  ;;  %vm116_vm2 = vcmask 1041409   ;;  %vm119_vm3 = vcmask 254976  }
  0xfe   :  { %v108_v52 = vrot.slane %v107_v50, 4  ;;  %s269_s24 = smov [#allocation7]  }
  0xff   :  { %v104_v53 = vadd.f32 %v103_v51, %v102_v49  ;;  %s127_s25 = sshll.u32 %s269_s24, 4  ;;  %s128_s25 = int_to_ptr.vmem [resolvable:$true] %s127_s25 }
 0x100   :  { %v109_v54 = vadd.f32 %v108_v52, %v107_v50  ;;  %s234_s3 = scalar_lea.vmem %s128_s25, 32  ;;  %p239_p11 = scmp.lt.s32.totalorder %s128_s25, %s128_s25 }
 0x101   :  { %v105_v56 = vrot.slane %v104_v53, 1  ;;  %p235_p10 = scmp.ne.s32.totalorder %s128_s25, %s234_s3  ;;  %p240_p12 = scmp.lt.s32.totalorder %s234_s3, %s234_s3 }
 0x102   :  { %v110_v55 = vrot.slane %v109_v54, 2 }
 0x103   :  { %v106_v59 = vadd.f32 %v105_v56, %v104_v53  ;;  %p241_p13 = por %p240_p12, %p239_p11 }
 0x104   :  { %v111_v57 = vadd.f32 %v110_v55, %v109_v54 }
 0x105   :  { %p242_p0 = pnand %p241_p13, %p235_p10 }
 0x106   :  { %v112_v58 = vrot.slane %v111_v57, 1 }
 0x108   :  { %v113_v60 = vadd.f32 %v112_v58, %v111_v57 }
 0x10a   :  { %v117_v61 = vsel %vm116_vm2, %v113_v60, %v106_v59 }
 0x10b   :  { %120 = vst.msk [vmem:[#allocation7] sm:$0x3] %vm119_vm3, %v117_v61 }
 0x10c   :  { %245 = shalt.err (!%p242_p0)
}
 0x10d   :  { %s246_s26 = scalar_lea.hbm %s350_s2, 32 }
 0x10e   :  { %p247_p1 = scmp.ne.s32.totalorder %s350_s2, %s246_s26  ;;  %p250_p2 = scmp.lt.u32.totalorder %s246_s26, %s350_s2 }
 0x110   :  { %p252_p3 = pnand %p250_p2, %p247_p1 }
 0x112   :  { %255 = shalt.err (!%p252_p3)
}
 0x113   :  { %130 = dma.vmem_to_hbm [thread:$0]  %s128_s25, 32, %s350_s2, [#allocation4]  }
 0x114   :  { %260 = dma.done.wait [#allocation4], 32  }
 0x115   :  { %261 = vsyncadd [#allocation4], 4294967264 }
 0x116   :  { %262 = dma.done.wait [#allocation9], 256  }
 0x117   :  { %263 = vsyncadd [#allocation9], 4294967040 }
 0x118   :  { %149 = vsyncpa [#allocation3], 1 }
 0x119   :  { %150 = vsyncpa [#allocation6], 1 }
 0x11a   :  { %151 = vsyncpa [#allocation4], 1 }
 0x11b   :  { %152 = vsyncpa [#allocation9], 1 }

</bundles_post_ra>
